<compile_context>
chip_gen: v5e
topology: v5e:2x2
jax: 0.10.0
libtpu: 0.0.40
codegen_flags: <defaults>
</compile_context>

<pallas_src>
import jax
import jax.numpy as jnp
from jax.experimental import pallas as pl
from jax.experimental.pallas import tpu as pltpu

INPUT_SIZE = 32                                # synthetic input feature size
LAYER_DIMS = (INPUT_SIZE, 128, 64, 32, 16, 1)  # matches the torch nn.Sequential
HIDDEN = LAYER_DIMS[1:]
NUM_LAYERS = len(HIDDEN)
N_MXU_LAYERS = 4                # layers 0-3 use the MXU; the 16->1 tail is VPU+XLU
FAN_IN = LAYER_DIMS[:N_MXU_LAYERS]             # (32, 128, 64, 32)
W_ROW_OFF = (0, 32, 160, 224)                  # row offsets inside the packed slab
W_ROWS = 256                                   # 32+128+64+32 (multiples of 16)
PAD = 128                                      # lane-dense hidden width
BIAS_ROWS = 8                                  # rows 0-4: biases, row 5: w4^T, 6-7: 0
BATCH = 256                                    # demo batch
ROW_TILE = 128                                 # rows/grid step (128 v5e; 256 v6e/v7x)


def mlp_kernel(x_ref, w_ref, b_ref, o_ref):
    """Fused 5-layer MLP forward for one row tile; parameters stay VMEM-resident."""
    h = x_ref[...]                                           # (T, 32) f32

    # 4 x (Linear + ReLU).  Output stays a lane-dense (T, 128) tile; lanes
    # beyond each layer's fan_out are exactly 0 (zero weight cols + zero bias
    # + ReLU), so slicing h[:, :fan_in] for the next layer is exact.
    for l in range(N_MXU_LAYERS):                            # static Python unroll
        fi = FAN_IN[l]
        w = w_ref[W_ROW_OFF[l]:W_ROW_OFF[l] + fi, :]         # (fi, 128) bf16
        b = b_ref[l:l + 1, :]                                # (1, 128)  f32
        h_in = h if l == 0 else h[:, :fi]
        h = jnp.dot(h_in.astype(jnp.bfloat16), w,
                    preferred_element_type=jnp.float32) + b
        h = jnp.maximum(h, 0.0)

    # Final 16 -> 1 layer: VPU multiply + XLU lane reduce (no 1-column MXU
    # matmul).  w5^T lives in bias-slab row 5; its lanes >= 16 are zero and so
    # are h's, so the full-lane reduce is exact.
    w_last = b_ref[5:6, :]                                   # (1, 128) f32
    b_last = b_ref[4:5, :][:, 0:1]                           # (1, 1)   f32
    h_q = h.astype(jnp.bfloat16).astype(jnp.float32)         # match ref quantization
    o_ref[...] = jnp.sum(h_q * w_last, axis=-1, keepdims=True) + b_last


def attendance_dnn_forward(x, w_slab, b_slab, *, row_tile=ROW_TILE):
    """x: (B, 32) f32.  w_slab: (256, 128) bf16.  b_slab: (8, 128) f32."""
    B, F = x.shape
    assert F == INPUT_SIZE
    row_tile = max(8, min(row_tile, ((B + 7) // 8) * 8))     # keep a multiple of 8
    b_pad = pl.cdiv(B, row_tile) * row_tile
    if b_pad != B:
        x = jnp.pad(x, ((0, b_pad - B), (0, 0)))             # padded rows are discarded

    flops = 2 * b_pad * sum(LAYER_DIMS[i] * LAYER_DIMS[i + 1]
                            for i in range(NUM_LAYERS))
    bytes_accessed = (x.size * 4 + w_slab.size * 2 + b_slab.size * 4 + b_pad * 4)

    out = pl.pallas_call(
        mlp_kernel,
        out_shape=jax.ShapeDtypeStruct((b_pad, 1), jnp.float32),
        grid=(b_pad // row_tile,),
        in_specs=[
            pl.BlockSpec((row_tile, F), lambda i: (i, 0)),
            # Constant index_maps: parameter slabs are DMA'd once on step 0 and
            # stay VMEM-resident for every subsequent row tile.
            pl.BlockSpec(w_slab.shape, lambda i: (0, 0)),
            pl.BlockSpec(b_slab.shape, lambda i: (0, 0)),
        ],
        out_specs=pl.BlockSpec((row_tile, 1), lambda i: (i, 0)),
        compiler_params=pltpu.CompilerParams(
            dimension_semantics=("parallel",)),              # v7x: 2 TCs split rows
        cost_estimate=pl.CostEstimate(
            flops=int(flops), transcendentals=0,
            bytes_accessed=int(bytes_accessed)),
    )(x, w_slab, b_slab)
    return out[:B]


def init_params(key, input_size):
    """nn.Linear-style init; weights stored as (in, out) and quantized to bf16."""
    dims = (input_size,) + HIDDEN
    params = []
    for li in range(NUM_LAYERS):
        fan_in, fan_out = dims[li], dims[li + 1]
        key, kw, kb = jax.random.split(key, 3)
        bound = 1.0 / jnp.sqrt(fan_in)
        w = jax.random.uniform(kw, (fan_in, fan_out), jnp.float32, -bound, bound)
        b = jax.random.uniform(kb, (1, fan_out), jnp.float32, -bound, bound)
        params.append((w.astype(jnp.bfloat16), b))
    return params


def pack_params(params):
    """Pack weights into a row-concatenated bf16 slab + one (8,128) f32 bias slab."""
    for w, _ in params:
        assert w.shape[1] <= PAD, "lane-dense invariant requires fan_out <= 128"
    w_slab = jnp.zeros((W_ROWS, PAD), jnp.bfloat16)
    b_slab = jnp.zeros((BIAS_ROWS, PAD), jnp.float32)
    for l in range(N_MXU_LAYERS):
        w, b = params[l]
        fi, fo = w.shape
        w_slab = w_slab.at[W_ROW_OFF[l]:W_ROW_OFF[l] + fi, :fo].set(w)
        b_slab = b_slab.at[l, :fo].set(b[0])
    w_last, b_last = params[N_MXU_LAYERS]                    # (16, 1), (1, 1)
    b_slab = b_slab.at[N_MXU_LAYERS, :1].set(b_last[0])
    b_slab = b_slab.at[5, :w_last.shape[0]].set(w_last[:, 0].astype(jnp.float32))
    return w_slab, b_slab


def reference_forward(x, params):
    """Pure-JAX reference with identical bf16-input / f32-accumulate numerics."""
    h = x
    for i, (w, b) in enumerate(params):
        hq = h.astype(jnp.bfloat16).astype(jnp.float32)
        h = jnp.dot(hq, w.astype(jnp.float32),
                    preferred_element_type=jnp.float32) + b
        if i < NUM_LAYERS - 1:
            h = jnp.maximum(h, 0.0)
    return h


if __name__ == "__main__":
    key = jax.random.PRNGKey(0)
    key, kx = jax.random.split(key)
    x = jax.random.normal(kx, (BATCH, INPUT_SIZE), jnp.float32)
    params = init_params(key, INPUT_SIZE)
    w_slab, b_slab = pack_params(params)

    out = attendance_dnn_forward(x, w_slab, b_slab)
    out = jax.block_until_ready(out)

    ref = reference_forward(x, params)
    assert out.shape == (BATCH, 1)
    assert jnp.allclose(out, ref, atol=1e-4, rtol=1e-4), "mismatch vs reference"

    print("KERNEL_OK")
</pallas_src>

<mosaic_0001>
module attributes {stable_mosaic.version = 11 : i64} {
  func.func @mlp_kernel(%arg0: i32, %arg1: memref<128x32xf32, #tpu.memory_space<vmem>>, %arg2: memref<256x128xbf16, #tpu.memory_space<vmem>>, %arg3: memref<8x128xf32, #tpu.memory_space<vmem>>, %arg4: memref<128x1xf32, #tpu.memory_space<vmem>>) attributes {dimension_semantics = [#tpu.dimension_semantics<parallel>], iteration_bounds = array<i64: 2>, scalar_prefetch = 0 : i64, scratch_operands = 0 : i64, tpu.core_type = #tpu.core_type<tc>, window_params = [{transform_indices = @transform_0, window_bounds = array<i64: 128, 32>}, {pipeline_mode = #tpu.pipeline_mode<synchronous>, transform_indices = @transform_1, window_bounds = array<i64: 256, 128>}, {pipeline_mode = #tpu.pipeline_mode<synchronous>, transform_indices = @transform_2, window_bounds = array<i64: 8, 128>}, {transform_indices = @transform_3, window_bounds = array<i64: 128, 1>}]} {
    %c0 = arith.constant 0 : index
    %c0_0 = arith.constant 0 : index
    %0 = vector.load %arg1[%c0, %c0_0] : memref<128x32xf32, #tpu.memory_space<vmem>>, vector<128x32xf32>
    %c0_1 = arith.constant 0 : index
    %c0_2 = arith.constant 0 : index
    %1 = vector.load %arg2[%c0_1, %c0_2] : memref<256x128xbf16, #tpu.memory_space<vmem>>, vector<32x128xbf16>
    %c0_3 = arith.constant 0 : index
    %c0_4 = arith.constant 0 : index
    %2 = vector.load %arg3[%c0_3, %c0_4] : memref<8x128xf32, #tpu.memory_space<vmem>>, vector<1x128xf32>
    %3 = arith.truncf %0 : vector<128x32xf32> to vector<128x32xbf16>
    %cst = arith.constant dense<0.000000e+00> : vector<128x128xf32>
    %4 = tpu.matmul %3, %1, %cst {dimension_numbers = #tpu.dot_dimension_numbers<[1], [0], [0], [1], [0, 0, 1, 1], [], []>} : vector<128x32xbf16>, vector<32x128xbf16>, vector<128x128xf32> -> vector<128x128xf32>
    %5 = vector.broadcast %2 : vector<1x128xf32> to vector<128x128xf32>
    %6 = arith.addf %4, %5 : vector<128x128xf32>
    %cst_5 = arith.constant 0.000000e+00 : f32
    %7 = vector.broadcast %cst_5 : f32 to vector<128x128xf32>
    %8 = arith.maximumf %6, %7 : vector<128x128xf32>
    %c32 = arith.constant 32 : index
    %c0_6 = arith.constant 0 : index
    %9 = vector.load %arg2[%c32, %c0_6] : memref<256x128xbf16, #tpu.memory_space<vmem>>, vector<128x128xbf16>
    %c1 = arith.constant 1 : index
    %c0_7 = arith.constant 0 : index
    %10 = vector.load %arg3[%c1, %c0_7] : memref<8x128xf32, #tpu.memory_space<vmem>>, vector<1x128xf32>
    %11 = arith.truncf %8 : vector<128x128xf32> to vector<128x128xbf16>
    %cst_8 = arith.constant dense<0.000000e+00> : vector<128x128xf32>
    %12 = tpu.matmul %11, %9, %cst_8 {dimension_numbers = #tpu.dot_dimension_numbers<[1], [0], [0], [1], [0, 0, 1, 1], [], []>} : vector<128x128xbf16>, vector<128x128xbf16>, vector<128x128xf32> -> vector<128x128xf32>
    %13 = vector.broadcast %10 : vector<1x128xf32> to vector<128x128xf32>
    %14 = arith.addf %12, %13 : vector<128x128xf32>
    %cst_9 = arith.constant 0.000000e+00 : f32
    %15 = vector.broadcast %cst_9 : f32 to vector<128x128xf32>
    %16 = arith.maximumf %14, %15 : vector<128x128xf32>
    %c160 = arith.constant 160 : index
    %c0_10 = arith.constant 0 : index
    %17 = vector.load %arg2[%c160, %c0_10] : memref<256x128xbf16, #tpu.memory_space<vmem>>, vector<64x128xbf16>
    %c2 = arith.constant 2 : index
    %c0_11 = arith.constant 0 : index
    %18 = vector.load %arg3[%c2, %c0_11] : memref<8x128xf32, #tpu.memory_space<vmem>>, vector<1x128xf32>
    %19 = vector.extract_strided_slice %16 {offsets = [0, 0], sizes = [128, 64], strides = [1, 1]} : vector<128x128xf32> to vector<128x64xf32>
    %20 = arith.truncf %19 : vector<128x64xf32> to vector<128x64xbf16>
    %cst_12 = arith.constant dense<0.000000e+00> : vector<128x128xf32>
    %21 = tpu.matmul %20, %17, %cst_12 {dimension_numbers = #tpu.dot_dimension_numbers<[1], [0], [0], [1], [0, 0, 1, 1], [], []>} : vector<128x64xbf16>, vector<64x128xbf16>, vector<128x128xf32> -> vector<128x128xf32>
    %22 = vector.broadcast %18 : vector<1x128xf32> to vector<128x128xf32>
    %23 = arith.addf %21, %22 : vector<128x128xf32>
    %cst_13 = arith.constant 0.000000e+00 : f32
    %24 = vector.broadcast %cst_13 : f32 to vector<128x128xf32>
    %25 = arith.maximumf %23, %24 : vector<128x128xf32>
    %c224 = arith.constant 224 : index
    %c0_14 = arith.constant 0 : index
    %26 = vector.load %arg2[%c224, %c0_14] : memref<256x128xbf16, #tpu.memory_space<vmem>>, vector<32x128xbf16>
    %c3 = arith.constant 3 : index
    %c0_15 = arith.constant 0 : index
    %27 = vector.load %arg3[%c3, %c0_15] : memref<8x128xf32, #tpu.memory_space<vmem>>, vector<1x128xf32>
    %28 = vector.extract_strided_slice %25 {offsets = [0, 0], sizes = [128, 32], strides = [1, 1]} : vector<128x128xf32> to vector<128x32xf32>
    %29 = arith.truncf %28 : vector<128x32xf32> to vector<128x32xbf16>
    %cst_16 = arith.constant dense<0.000000e+00> : vector<128x128xf32>
    %30 = tpu.matmul %29, %26, %cst_16 {dimension_numbers = #tpu.dot_dimension_numbers<[1], [0], [0], [1], [0, 0, 1, 1], [], []>} : vector<128x32xbf16>, vector<32x128xbf16>, vector<128x128xf32> -> vector<128x128xf32>
    %31 = vector.broadcast %27 : vector<1x128xf32> to vector<128x128xf32>
    %32 = arith.addf %30, %31 : vector<128x128xf32>
    %cst_17 = arith.constant 0.000000e+00 : f32
    %33 = vector.broadcast %cst_17 : f32 to vector<128x128xf32>
    %34 = arith.maximumf %32, %33 : vector<128x128xf32>
    %c5 = arith.constant 5 : index
    %c0_18 = arith.constant 0 : index
    %35 = vector.load %arg3[%c5, %c0_18] : memref<8x128xf32, #tpu.memory_space<vmem>>, vector<1x128xf32>
    %c4 = arith.constant 4 : index
    %c0_19 = arith.constant 0 : index
    %36 = vector.load %arg3[%c4, %c0_19] : memref<8x128xf32, #tpu.memory_space<vmem>>, vector<1x128xf32>
    %37 = vector.extract_strided_slice %36 {offsets = [0, 0], sizes = [1, 1], strides = [1, 1]} : vector<1x128xf32> to vector<1x1xf32>
    %38 = arith.truncf %34 : vector<128x128xf32> to vector<128x128xbf16>
    %39 = arith.extf %38 : vector<128x128xbf16> to vector<128x128xf32>
    %40 = vector.broadcast %35 : vector<1x128xf32> to vector<128x128xf32>
    %41 = arith.mulf %39, %40 : vector<128x128xf32>
    %cst_20 = arith.constant dense<0.000000e+00> : vector<128xf32>
    %42 = vector.multi_reduction <add>, %41, %cst_20 [1] : vector<128x128xf32> to vector<128xf32>
    %43 = vector.shape_cast %42 : vector<128xf32> to vector<128x1xf32>
    %44 = vector.broadcast %37 : vector<1x1xf32> to vector<128x1xf32>
    %45 = arith.addf %43, %44 : vector<128x1xf32>
    %c0_21 = arith.constant 0 : index
    %c0_22 = arith.constant 0 : index
    %46 = vector.load %arg4[%c0_21, %c0_22] : memref<128x1xf32, #tpu.memory_space<vmem>>, vector<128x1xf32>
    tpu.vector_store %arg4[%c0_21, %c0_22], %45 {strides = array<i32>} : memref<128x1xf32, #tpu.memory_space<vmem>>, vector<128x1xf32>,
    return
  }
  func.func @transform_0(%arg0: i32) -> (i32, i32) {
    %c0_i32 = arith.constant 0 : i32
    %c0_i32_0 = arith.constant 0 : i32
    return %arg0, %c0_i32 : i32, i32
  }
  func.func @transform_1(%arg0: i32) -> (i32, i32) {
    %c0_i32 = arith.constant 0 : i32
    %c0_i32_0 = arith.constant 0 : i32
    %c0_i32_1 = arith.constant 0 : i32
    return %c0_i32, %c0_i32_0 : i32, i32
  }
  func.func @transform_2(%arg0: i32) -> (i32, i32) {
    %c0_i32 = arith.constant 0 : i32
    %c0_i32_0 = arith.constant 0 : i32
    %c0_i32_1 = arith.constant 0 : i32
    return %c0_i32, %c0_i32_0 : i32, i32
  }
  func.func @transform_3(%arg0: i32) -> (i32, i32) {
    %c0_i32 = arith.constant 0 : i32
    %c0_i32_0 = arith.constant 0 : i32
    return %arg0, %c0_i32 : i32, i32
  }
}

</mosaic_0001>

<bundles_post_ra>
// kernel: tpu_custom_call.1
= control target key start
LH: loop header
LB: loop body
LE: loop exit
PB: predicated region body
PF: predicated region fallthrough
CT: control target
= control target key end

     0   :  { %s1031_s12 = smov 0   ;;  %s1251_s0 = inlined_call_operand.vmem [shape: f32[256,32], index: 0, kind: input, shape index: {}]   ;;  %s1252_s1 = inlined_call_operand.vmem [shape: bf16[256,128], index: 1, kind: input, shape index: {}]   ;;  %s1253_s2 = inlined_call_operand.vmem [shape: f32[8,128], index: 2, kind: input, shape index: {}]   ;;  %s1254_s3 = inlined_call_operand.vmem [shape: f32[256,1], index: 3, kind: output, shape index: {}]  }
   0x1 LB: > { %s866_s13 = sadd.s32 4294967295, %s1009_s12   ;;  %p870_p0 = scmp.ge.s32.totalorder %s1009_s12, 1  ;;  %s1009_s12 = sphi %s1031_s12, %s13_s12  }
   0x2   : > { %p138_p1 = scmp.lt.s32.totalorder %s1009_s12, 3 }
   0x4   : > { %p139_p2 = pnand %p870_p0, %p138_p1 }
   0x5   : > { %s871_s16 = sshll.u32 (!%p139_p2), %s866_s13, 4 }
   0x6   : > { %142 = sbr.rel (%p139_p2) target bundleno = 826 (0x33a), region = 32  ;;  %p163_p3 = scmp.lt.s32.totalorder (!%p139_p2), %s871_s16, 31 }
   0xb   : > { %v966_v0 = vld [vmem:[%s1252_s1 + $0x8] sm:$0xff]  ;;  %v965_v2 = vld [vmem:[%s1252_s1] sm:$0xff]  ;;  %s1256_s16 = smov (!%p163_p3, %s871_s16), 31  ;;  %vm217_vm0 = vcmask 261120   ;;  %v972_v7 = vld [vmem:[%s1252_s1 + $0x38] sm:$0xff]  ;;  %vm488_vm1 = vcmask 523264  }
   0xc   : > { %v974_v1 = vld [vmem:[%s1252_s1 + $0x48] sm:$0xff]  ;;  %248 = vmatpush.bf16.msra.mxu0 %v966_v0  ;;  %v973_v3 = vld [vmem:[%s1252_s1 + $0x40] sm:$0xff]  ;;  %s872_s23 = sshll.u32 %s1256_s16, 3  ;;  %v971_v11 = vld [vmem:[%s1252_s1 + $0x30] sm:$0xff]  ;;  %vm793_vm2 = vcmask 7168  }
   0xd   : > { %981 = vmatpush.bf16.msra.mxu1 %v974_v1  ;;  %s1059_s26 = scalar_lea.vmem %s1251_s0, %s872_s23  ;;  %v970_v15 = vld [vmem:[%s1252_s1 + $0x28] sm:$0xff]  ;;  %v969_v19 = vld [vmem:[%s1252_s1 + $0x20] sm:$0xff]  ;;  %v968_v23 = vld [vmem:[%s1252_s1 + $0x18] sm:$0xff]  ;;  %s1213_s15 = scalar_lea.vmem %s1254_s3, %s872_s23 }
   0xe   : > { %v175_v4 = vld [vmem:[%s1059_s26] sm:$0xff]  ;;  %v176_v5 = vld [vmem:[%s1059_s26 + $0x8] sm:$0xff]  ;;  %v177_v8 = vld [vmem:[%s1059_s26 + $0x10] sm:$0xff] }
   0xf   : > { %v196_v6 = vpack.c.bf16 %v176_v5, %v175_v4  ;;  %v178_v9 = vld [vmem:[%s1059_s26 + $0x18] sm:$0xff]  ;;  %v179_v12 = vld [vmem:[%s1059_s26 + $0x20] sm:$0xff]  ;;  %v180_v13 = vld [vmem:[%s1059_s26 + $0x28] sm:$0xff] }
  0x10   : > { %249 = vmatpush.bf16.msra.mxu0 %v965_v2  ;;  %v197_v10 = vpack.c.bf16 %v178_v9, %v177_v8  ;;  %v198_v14 = vpack.c.bf16 %v180_v13, %v179_v12  ;;  %v181_v16 = vld [vmem:[%s1059_s26 + $0x30] sm:$0xff]  ;;  %v182_v17 = vld [vmem:[%s1059_s26 + $0x38] sm:$0xff]  ;;  %v183_v20 = vld [vmem:[%s1059_s26 + $0x40] sm:$0xff] }
  0x11   : > { %982 = vmatpush.bf16.msra.mxu1 %v973_v3  ;;  %v199_v18 = vpack.c.bf16 %v182_v17, %v181_v16  ;;  %v184_v21 = vld [vmem:[%s1059_s26 + $0x48] sm:$0xff]  ;;  %v185_v24 = vld [vmem:[%s1059_s26 + $0x50] sm:$0xff]  ;;  %v186_v25 = vld [vmem:[%s1059_s26 + $0x58] sm:$0xff] }
  0x12   : > { %v200_v22 = vpack.c.bf16 %v184_v21, %v183_v20  ;;  %v201_v26 = vpack.c.bf16 %v186_v25, %v185_v24  ;;  %v967_v27 = vld [vmem:[%s1252_s1 + $0x10] sm:$0xff]  ;;  %v187_v28 = vld [vmem:[%s1059_s26 + $0x60] sm:$0xff]  ;;  %v188_v29 = vld [vmem:[%s1059_s26 + $0x68] sm:$0xff] }
  0x13   : > { %883 = vmatmul.msk.bf16.vlgmr.msra.gmra.mxu0 %vm217_vm0, %v196_v6  ;;  %v202_v30 = vpack.c.bf16 %v188_v29, %v187_v28  ;;  %v189_v31 = vld [vmem:[%s1059_s26 + $0x70] sm:$0xff]  ;;  %v190_v32 = vld [vmem:[%s1059_s26 + $0x78] sm:$0xff]  ;;  %v1106_v35 = vld [vmem:[%s1253_s2] ss:$0 sm:$0xff] }
  0x14   : > { %381 = vmatpush.bf16.msrb.mxu0 %v974_v1  ;;  %v203_v33 = vpack.c.bf16 %v190_v32, %v189_v31  ;;  %v978_v17 = vld [vmem:[%s1252_s1 + $0x68] sm:$0xff]  ;;  %v977_v21 = vld [vmem:[%s1252_s1 + $0x60] sm:$0xff]  ;;  %v975_v24 = vld [vmem:[%s1252_s1 + $0x50] sm:$0xff] }
  0x15   : > { %983 = vmatpush.bf16.msra.mxu1 %v972_v7  ;;  %517 = vmatpush.bf16.msra.mxu2 %v978_v17  ;;  %v998_v32 = vld [vmem:[%s1253_s2 + $0x1] ss:$0 sm:$0xff] }
  0x18   : > { %382 = vmatpush.bf16.msrb.mxu0 %v973_v3 }
  0x19   : > { %984 = vmatpush.bf16.msra.mxu1 %v971_v11  ;;  %518 = vmatpush.bf16.msra.mxu2 %v977_v21 }
  0x1c   : > { %383 = vmatpush.bf16.msrb.mxu0 %v972_v7 }
  0x1d   : > { %985 = vmatpush.bf16.msra.mxu1 %v970_v15 }
  0x20   : > { %384 = vmatpush.bf16.msrb.mxu0 %v971_v11 }
  0x21   : > { %986 = vmatpush.bf16.msra.mxu1 %v969_v19 }
  0x23   : > { %884 = vmatmul.msk.bf16.gmra.mxu0 %vm217_vm0, %v197_v10 }
  0x24   : > { %385 = vmatpush.bf16.msrb.mxu0 %v970_v15 }
  0x25   : > { %987 = vmatpush.bf16.msra.mxu1 %v968_v23 }
  0x28   : > { %386 = vmatpush.bf16.msrb.mxu0 %v969_v19 }
  0x29   : > { %988 = vmatpush.bf16.msra.mxu1 %v967_v27 }
  0x2c   : > { %387 = vmatpush.bf16.msrb.mxu0 %v968_v23  ;;  %v976_v23 = vld [vmem:[%s1252_s1 + $0x58] sm:$0xff] }
  0x2d   : > { %519 = vmatpush.bf16.msra.mxu2 %v976_v23 }
  0x30   : > { %388 = vmatpush.bf16.msrb.mxu0 %v967_v27 }
  0x31   : > { %520 = vmatpush.bf16.msra.mxu2 %v975_v24  ;;  %v979_v24 = vld [vmem:[%s1252_s1 + $0x70] sm:$0xff] }
  0x33   : > { %885 = vmatmul.msk.bf16.gmra.mxu0 %vm217_vm0, %v198_v14 }
  0x43   : > { %886 = vmatmul.msk.bf16.gmra.mxu0 %vm217_vm0, %v199_v18 }
  0x53   : > { %887 = vmatmul.msk.bf16.gmra.mxu0 %vm217_vm0, %v200_v22 }
  0x63   : > { %888 = vmatmul.msk.bf16.gmra.mxu0 %vm217_vm0, %v201_v26 }
  0x73   : > { %889 = vmatmul.msk.bf16.gmra.mxu0 %vm217_vm0, %v202_v30 }
  0x83   : > { %890 = vmatmul.msk.bf16.gmra.mxu0 %vm217_vm0, %v203_v33 }
  0x90   : > { %v251_v34 = vpop.f32.mrf.mxu0 }
  0x91   : > { %v252_v36 = vadd.f32 %v1106_v35, %v251_v34 }
  0x93   : > { %v291_v39 = vmax.f32 %v252_v36, 0.0 }
  0x98   : > { %v253_v37 = vpop.f32.mrf.mxu0 }
  0x99   : > { %v254_v38 = vadd.f32 %v1106_v35, %v253_v37 }
  0x9b   : > { %v292_v40 = vmax.f32 %v254_v38, 0.0 }
  0x9d   : > { %v324_v41 = vpack.c.bf16 %v292_v40, %v291_v39 }
  0x9f   : > { %389 = vmatmul.bf16.vlgmr.msrb.gmra.mxu0 %v324_v41 }
  0xa0   : > { %v256_v42 = vpop.f32.mrf.mxu0 }
  0xa1   : > { %v257_v43 = vadd.f32 %v1106_v35, %v256_v42 }
  0xa3   : > { %v293_v46 = vmax.f32 %v257_v43, 0.0 }
  0xa8   : > { %v258_v44 = vpop.f32.mrf.mxu0 }
  0xa9   : > { %v259_v45 = vadd.f32 %v1106_v35, %v258_v44 }
  0xab   : > { %v294_v47 = vmax.f32 %v259_v45, 0.0 }
  0xad   : > { %v325_v48 = vpack.c.bf16 %v294_v47, %v293_v46 }
  0xaf   : > { %394 = vmatmul.bf16.vlgmr.msra.gmra.mxu1 %v325_v48 }
  0xb0   : > { %v261_v49 = vpop.f32.mrf.mxu0 }
  0xb1   : > { %v262_v50 = vadd.f32 %v1106_v35, %v261_v49 }
  0xb3   : > { %v295_v53 = vmax.f32 %v262_v50, 0.0 }
  0xb8   : > { %v263_v51 = vpop.f32.mrf.mxu0 }
  0xb9   : > { %v264_v52 = vadd.f32 %v1106_v35, %v263_v51 }
  0xbb   : > { %v296_v54 = vmax.f32 %v264_v52, 0.0 }
  0xbd   : > { %v326_v55 = vpack.c.bf16 %v296_v54, %v295_v53 }
  0xbf   : > { %399 = vmatmul.bf16.gmra.mxu1 %v326_v55 }
  0xc0   : > { %v266_v56 = vpop.f32.mrf.mxu0 }
  0xc1   : > { %v267_v57 = vadd.f32 %v1106_v35, %v266_v56 }
  0xc3   : > { %v297_v60 = vmax.f32 %v267_v57, 0.0 }
  0xc8   : > { %v268_v58 = vpop.f32.mrf.mxu0 }
  0xc9   : > { %v269_v59 = vadd.f32 %v1106_v35, %v268_v58 }
  0xcb   : > { %v298_v61 = vmax.f32 %v269_v59, 0.0 }
  0xcd   : > { %v327_v62 = vpack.c.bf16 %v298_v61, %v297_v60 }
  0xcf   : > { %404 = vmatmul.bf16.gmra.mxu1 %v327_v62 }
  0xd0   : > { %v271_v63 = vpop.f32.mrf.mxu0 }
  0xd1   : > { %v272_v0 = vadd.f32 %v1106_v35, %v271_v63 }
  0xd3   : > { %v299_v3 = vmax.f32 %v272_v0, 0.0 }
  0xd8   : > { %v273_v1 = vpop.f32.mrf.mxu0 }
  0xd9   : > { %v274_v2 = vadd.f32 %v1106_v35, %v273_v1 }
  0xdb   : > { %v300_v4 = vmax.f32 %v274_v2, 0.0 }
  0xdd   : > { %v328_v5 = vpack.c.bf16 %v300_v4, %v299_v3 }
  0xdf   : > { %409 = vmatmul.bf16.gmra.mxu1 %v328_v5 }
  0xe0   : > { %v276_v6 = vpop.f32.mrf.mxu0 }
  0xe1   : > { %v277_v7 = vadd.f32 %v1106_v35, %v276_v6 }
  0xe3   : > { %v301_v10 = vmax.f32 %v277_v7, 0.0 }
  0xe8   : > { %v278_v8 = vpop.f32.mrf.mxu0 }
  0xe9   : > { %v279_v9 = vadd.f32 %v1106_v35, %v278_v8 }
  0xeb   : > { %v302_v11 = vmax.f32 %v279_v9, 0.0 }
  0xed   : > { %v329_v12 = vpack.c.bf16 %v302_v11, %v301_v10 }
  0xef   : > { %414 = vmatmul.bf16.gmra.mxu1 %v329_v12 }
  0xf0   : > { %v281_v13 = vpop.f32.mrf.mxu0 }
  0xf1   : > { %v282_v14 = vadd.f32 %v1106_v35, %v281_v13 }
  0xf3   : > { %v303_v18 = vmax.f32 %v282_v14, 0.0 }
  0xf8   : > { %v283_v15 = vpop.f32.mrf.mxu0 }
  0xf9   : > { %v284_v16 = vadd.f32 %v1106_v35, %v283_v15 }
  0xfb   : > { %v304_v19 = vmax.f32 %v284_v16, 0.0 }
  0xfd   : > { %v330_v20 = vpack.c.bf16 %v304_v19, %v303_v18 }
  0xff   : > { %419 = vmatmul.bf16.gmra.mxu1 %v330_v20  ;;  %v980_v20 = vld [vmem:[%s1252_s1 + $0x78] sm:$0xff] }
 0x100   : > { %v286_v22 = vpop.f32.mrf.mxu0  ;;  %634 = vmatpush.bf16.msra.mxu3 %v980_v20 }
 0x101   : > { %v287_v25 = vadd.f32 %v1106_v35, %v286_v22 }
 0x103   : > { %v305_v28 = vmax.f32 %v287_v25, 0.0 }
 0x104   : > { %635 = vmatpush.bf16.msra.mxu3 %v979_v24  ;;  %v1173_v24 = vld [vmem:[%s1253_s2 + $0x5] ss:$0 sm:$0xff] }
 0x108   : > { %v288_v26 = vpop.f32.mrf.mxu0 }
 0x109   : > { %v289_v27 = vadd.f32 %v1106_v35, %v288_v26 }
 0x10b   : > { %v306_v29 = vmax.f32 %v289_v27, 0.0  ;;  %v999_v27 = vld [vmem:[%s1253_s2 + $0x2] ss:$0 sm:$0xff] }
 0x10d   : > { %v331_v30 = vpack.c.bf16 %v306_v29, %v305_v28 }
 0x10f   : > { %424 = vmatmul.bf16.gmra.mxu1 %v331_v30 }
 0x11c   : > { %v390_v31 = vpop.f32.mrf.mxu0 }
 0x11d   : > { %v391_v33 = vadd.f32 %v998_v32, %v390_v31 }
 0x11f   : > { %v430_v37 = vmax.f32 %v391_v33, 0.0 }
 0x124   : > { %v392_v34 = vpop.f32.mrf.mxu0 }
 0x125   : > { %v393_v36 = vadd.f32 %v998_v32, %v392_v34 }
 0x127   : > { %v431_v38 = vmax.f32 %v393_v36, 0.0 }
 0x129   : > { %v455_v39 = vpack.c.bf16 %v431_v38, %v430_v37 }
 0x12b   : > { %939 = vmatmul.msk.bf16.vlgmr.msra.gmra.mxu2 %vm488_vm1, %v455_v39 }
 0x12c   : > { %v395_v40 = vpop.f32.mrf.mxu1 }
 0x12d   : > { %v396_v35 = vadd.f32 %v998_v32, %v395_v40 }
 0x12f   : > { %v432_v43 = vmax.f32 %v396_v35, 0.0 }
 0x134   : > { %v397_v41 = vpop.f32.mrf.mxu1 }
 0x135   : > { %v398_v42 = vadd.f32 %v998_v32, %v397_v41 }
 0x137   : > { %v433_v44 = vmax.f32 %v398_v42, 0.0 }
 0x139   : > { %v456_v45 = vpack.c.bf16 %v433_v44, %v432_v43 }
 0x13b   : > { %940 = vmatmul.msk.bf16.gmra.mxu2 %vm488_vm1, %v456_v45 }
 0x13c   : > { %v400_v46 = vpop.f32.mrf.mxu1 }
 0x13d   : > { %v401_v47 = vadd.f32 %v998_v32, %v400_v46 }
 0x13f   : > { %v434_v50 = vmax.f32 %v401_v47, 0.0 }
 0x144   : > { %v402_v48 = vpop.f32.mrf.mxu1 }
 0x145   : > { %v403_v49 = vadd.f32 %v998_v32, %v402_v48 }
 0x147   : > { %v435_v51 = vmax.f32 %v403_v49, 0.0 }
 0x149   : > { %v457_v52 = vpack.c.bf16 %v435_v51, %v434_v50 }
 0x14b   : > { %941 = vmatmul.msk.bf16.gmra.mxu2 %vm488_vm1, %v457_v52 }
 0x14c   : > { %v405_v53 = vpop.f32.mrf.mxu1 }
 0x14d   : > { %v406_v54 = vadd.f32 %v998_v32, %v405_v53 }
 0x14f   : > { %v436_v57 = vmax.f32 %v406_v54, 0.0 }
 0x154   : > { %v407_v55 = vpop.f32.mrf.mxu1 }
 0x155   : > { %v408_v56 = vadd.f32 %v998_v32, %v407_v55 }
 0x157   : > { %v437_v58 = vmax.f32 %v408_v56, 0.0 }
 0x159   : > { %v458_v59 = vpack.c.bf16 %v437_v58, %v436_v57 }
 0x15b   : > { %942 = vmatmul.msk.bf16.gmra.mxu2 %vm488_vm1, %v458_v59 }
 0x15c   : > { %v410_v60 = vpop.f32.mrf.mxu1 }
 0x15d   : > { %v411_v61 = vadd.f32 %v998_v32, %v410_v60 }
 0x15f   : > { %v438_v0 = vmax.f32 %v411_v61, 0.0 }
 0x164   : > { %v412_v62 = vpop.f32.mrf.mxu1 }
 0x165   : > { %v413_v63 = vadd.f32 %v998_v32, %v412_v62 }
 0x167   : > { %v439_v1 = vmax.f32 %v413_v63, 0.0 }
 0x169   : > { %v459_v2 = vpack.c.bf16 %v439_v1, %v438_v0 }
 0x16b   : > { %943 = vmatmul.msk.bf16.gmra.mxu2 %vm488_vm1, %v459_v2 }
 0x16c   : > { %v415_v3 = vpop.f32.mrf.mxu1 }
 0x16d   : > { %v416_v4 = vadd.f32 %v998_v32, %v415_v3 }
 0x16f   : > { %v440_v7 = vmax.f32 %v416_v4, 0.0 }
 0x174   : > { %v417_v5 = vpop.f32.mrf.mxu1 }
 0x175   : > { %v418_v6 = vadd.f32 %v998_v32, %v417_v5 }
 0x177   : > { %v441_v8 = vmax.f32 %v418_v6, 0.0 }
 0x179   : > { %v460_v9 = vpack.c.bf16 %v441_v8, %v440_v7 }
 0x17b   : > { %944 = vmatmul.msk.bf16.gmra.mxu2 %vm488_vm1, %v460_v9 }
 0x17c   : > { %v420_v10 = vpop.f32.mrf.mxu1 }
 0x17d   : > { %v421_v11 = vadd.f32 %v998_v32, %v420_v10 }
 0x17f   : > { %v442_v14 = vmax.f32 %v421_v11, 0.0 }
 0x184   : > { %v422_v12 = vpop.f32.mrf.mxu1 }
 0x185   : > { %v423_v13 = vadd.f32 %v998_v32, %v422_v12 }
 0x187   : > { %v443_v15 = vmax.f32 %v423_v13, 0.0 }
 0x189   : > { %v461_v16 = vpack.c.bf16 %v443_v15, %v442_v14 }
 0x18b   : > { %945 = vmatmul.msk.bf16.gmra.mxu2 %vm488_vm1, %v461_v16 }
 0x18c   : > { %v425_v17 = vpop.f32.mrf.mxu1 }
 0x18d   : > { %v426_v18 = vadd.f32 %v998_v32, %v425_v17 }
 0x18f   : > { %v444_v22 = vmax.f32 %v426_v18, 0.0 }
 0x194   : > { %v427_v19 = vpop.f32.mrf.mxu1 }
 0x195   : > { %v428_v21 = vadd.f32 %v998_v32, %v427_v19  ;;  %v1167_v19 = vld [vmem:[%s1253_s2 + $0x3] ss:$0 sm:$0xff] }
 0x197   : > { %v445_v23 = vmax.f32 %v428_v21, 0.0 }
 0x199   : > { %v462_v25 = vpack.c.bf16 %v445_v23, %v444_v22 }
 0x19b   : > { %946 = vmatmul.msk.bf16.gmra.mxu2 %vm488_vm1, %v462_v25 }
 0x1ae   : > { %v522_v26 = vpop.f32.mrf.mxu2 }
 0x1af   : > { %v523_v28 = vadd.f32 %v999_v27, %v522_v26 }
 0x1b1   : > { %v562_v31 = vmax.f32 %v523_v28, 0.0 }
 0x1b6   : > { %v524_v29 = vpop.f32.mrf.mxu2 }
 0x1b7   : > { %v525_v30 = vadd.f32 %v999_v27, %v524_v29 }
 0x1b9   : > { %v563_v32 = vmax.f32 %v525_v30, 0.0 }
 0x1bb   : > { %v583_v33 = vpack.c.bf16 %v563_v32, %v562_v31 }
 0x1bd   : > { %955 = vmatmul.msk.bf16.vlgmr.msra.gmra.mxu3 %vm217_vm0, %v583_v33 }
 0x1be   : > { %v527_v34 = vpop.f32.mrf.mxu2 }
 0x1bf   : > { %v528_v36 = vadd.f32 %v999_v27, %v527_v34 }
 0x1c1   : > { %v564_v39 = vmax.f32 %v528_v36, 0.0 }
 0x1c6   : > { %v529_v37 = vpop.f32.mrf.mxu2 }
 0x1c7   : > { %v530_v38 = vadd.f32 %v999_v27, %v529_v37 }
 0x1c9   : > { %v565_v40 = vmax.f32 %v530_v38, 0.0 }
 0x1cb   : > { %v584_v35 = vpack.c.bf16 %v565_v40, %v564_v39 }
 0x1cd   : > { %956 = vmatmul.msk.bf16.gmra.mxu3 %vm217_vm0, %v584_v35 }
 0x1ce   : > { %v532_v41 = vpop.f32.mrf.mxu2 }
 0x1cf   : > { %v533_v42 = vadd.f32 %v999_v27, %v532_v41 }
 0x1d1   : > { %v566_v45 = vmax.f32 %v533_v42, 0.0 }
 0x1d6   : > { %v534_v43 = vpop.f32.mrf.mxu2 }
 0x1d7   : > { %v535_v44 = vadd.f32 %v999_v27, %v534_v43 }
 0x1d9   : > { %v567_v46 = vmax.f32 %v535_v44, 0.0 }
 0x1db   : > { %v585_v47 = vpack.c.bf16 %v567_v46, %v566_v45 }
 0x1dd   : > { %957 = vmatmul.msk.bf16.gmra.mxu3 %vm217_vm0, %v585_v47 }
 0x1de   : > { %v537_v48 = vpop.f32.mrf.mxu2 }
 0x1df   : > { %v538_v49 = vadd.f32 %v999_v27, %v537_v48 }
 0x1e1   : > { %v568_v52 = vmax.f32 %v538_v49, 0.0 }
 0x1e6   : > { %v539_v50 = vpop.f32.mrf.mxu2 }
 0x1e7   : > { %v540_v51 = vadd.f32 %v999_v27, %v539_v50 }
 0x1e9   : > { %v569_v53 = vmax.f32 %v540_v51, 0.0 }
 0x1eb   : > { %v586_v54 = vpack.c.bf16 %v569_v53, %v568_v52 }
 0x1ed   : > { %958 = vmatmul.msk.bf16.gmra.mxu3 %vm217_vm0, %v586_v54 }
 0x1ee   : > { %v542_v55 = vpop.f32.mrf.mxu2 }
 0x1ef   : > { %v543_v56 = vadd.f32 %v999_v27, %v542_v55 }
 0x1f1   : > { %v570_v59 = vmax.f32 %v543_v56, 0.0 }
 0x1f6   : > { %v544_v57 = vpop.f32.mrf.mxu2 }
 0x1f7   : > { %v545_v58 = vadd.f32 %v999_v27, %v544_v57 }
 0x1f9   : > { %v571_v60 = vmax.f32 %v545_v58, 0.0 }
 0x1fb   : > { %v587_v61 = vpack.c.bf16 %v571_v60, %v570_v59 }
 0x1fd   : > { %959 = vmatmul.msk.bf16.gmra.mxu3 %vm217_vm0, %v587_v61 }
 0x1fe   : > { %v547_v62 = vpop.f32.mrf.mxu2 }
 0x1ff   : > { %v548_v63 = vadd.f32 %v999_v27, %v547_v62 }
 0x201   : > { %v572_v2 = vmax.f32 %v548_v63, 0.0 }
 0x206   : > { %v549_v0 = vpop.f32.mrf.mxu2 }
 0x207   : > { %v550_v1 = vadd.f32 %v999_v27, %v549_v0 }
 0x209   : > { %v573_v3 = vmax.f32 %v550_v1, 0.0 }
 0x20b   : > { %v588_v4 = vpack.c.bf16 %v573_v3, %v572_v2 }
 0x20d   : > { %960 = vmatmul.msk.bf16.gmra.mxu3 %vm217_vm0, %v588_v4 }
 0x20e   : > { %v552_v5 = vpop.f32.mrf.mxu2 }
 0x20f   : > { %v553_v6 = vadd.f32 %v999_v27, %v552_v5 }
 0x211   : > { %v574_v9 = vmax.f32 %v553_v6, 0.0 }
 0x216   : > { %v554_v7 = vpop.f32.mrf.mxu2 }
 0x217   : > { %v555_v8 = vadd.f32 %v999_v27, %v554_v7 }
 0x219   : > { %v575_v10 = vmax.f32 %v555_v8, 0.0 }
 0x21b   : > { %v589_v11 = vpack.c.bf16 %v575_v10, %v574_v9 }
 0x21d   : > { %961 = vmatmul.msk.bf16.gmra.mxu3 %vm217_vm0, %v589_v11 }
 0x21e   : > { %v557_v12 = vpop.f32.mrf.mxu2 }
 0x21f   : > { %v558_v13 = vadd.f32 %v999_v27, %v557_v12 }
 0x221   : > { %v576_v16 = vmax.f32 %v558_v13, 0.0 }
 0x226   : > { %v559_v14 = vpop.f32.mrf.mxu2 }
 0x227   : > { %v560_v15 = vadd.f32 %v999_v27, %v559_v14 }
 0x229   : > { %v577_v17 = vmax.f32 %v560_v15, 0.0 }
 0x22b   : > { %v590_v18 = vpack.c.bf16 %v577_v17, %v576_v16 }
 0x22d   : > { %962 = vmatmul.msk.bf16.gmra.mxu3 %vm217_vm0, %v590_v18 }
 0x240   : > { %v637_v20 = vpop.f32.mrf.mxu3 }
 0x241   : > { %v638_v21 = vadd.f32 %v1167_v19, %v637_v20 }
 0x243   : > { %v677_v22 = vmax.f32 %v638_v21, 0.0 }
 0x245   : > { %v695_v23 = vpack.c.bf16 %v677_v22, %v677_v22 }
 0x247   : > { %v711_v25 = vunpack.c.l.bf16 %v695_v23 }
 0x248   : > { %v639_v26 = vpop.f32.mrf.mxu3 }
 0x249   : > { %v640_v27 = vadd.f32 %v1167_v19, %v639_v26  ;;  %v728_v28 = vmul.f32 %v1173_v24, %v711_v25 }
 0x24b   : > { %v678_v29 = vmax.f32 %v640_v27, 0.0  ;;  %744 = vadd.xlane.f32.xlu0 %v728_v28 }
 0x24d   : > { %v696_v30 = vpack.c.bf16 %v678_v29, %v678_v29 }
 0x24f   : > { %v712_v31 = vunpack.c.l.bf16 %v696_v30 }
 0x250   : > { %v642_v32 = vpop.f32.mrf.mxu3 }
 0x251   : > { %v643_v33 = vadd.f32 %v1167_v19, %v642_v32  ;;  %v729_v34 = vmul.f32 %v1173_v24, %v712_v31 }
 0x253   : > { %v679_v36 = vmax.f32 %v643_v33, 0.0  ;;  %746 = vadd.xlane.f32.xlu0 %v729_v34 }
 0x255   : > { %v697_v37 = vpack.c.bf16 %v679_v36, %v679_v36 }
 0x257   : > { %v713_v38 = vunpack.c.l.bf16 %v697_v37 }
 0x258   : > { %v644_v39 = vpop.f32.mrf.mxu3 }
 0x259   : > { %v645_v40 = vadd.f32 %v1167_v19, %v644_v39  ;;  %v730_v35 = vmul.f32 %v1173_v24, %v713_v38 }
 0x25b   : > { %v680_v41 = vmax.f32 %v645_v40, 0.0  ;;  %748 = vadd.xlane.f32.xlu1 %v730_v35 }
 0x25d   : > { %v698_v42 = vpack.c.bf16 %v680_v41, %v680_v41 }
 0x25f   : > { %v714_v43 = vunpack.c.l.bf16 %v698_v42 }
 0x260   : > { %v647_v44 = vpop.f32.mrf.mxu3 }
 0x261   : > { %v648_v45 = vadd.f32 %v1167_v19, %v647_v44  ;;  %v731_v46 = vmul.f32 %v1173_v24, %v714_v43 }
 0x263   : > { %v681_v47 = vmax.f32 %v648_v45, 0.0  ;;  %750 = vadd.xlane.f32.xlu1 %v731_v46 }
 0x265   : > { %v699_v48 = vpack.c.bf16 %v681_v47, %v681_v47 }
 0x267   : > { %v715_v49 = vunpack.c.l.bf16 %v699_v48 }
 0x268   : > { %v649_v50 = vpop.f32.mrf.mxu3 }
 0x269   : > { %v650_v51 = vadd.f32 %v1167_v19, %v649_v50  ;;  %v732_v52 = vmul.f32 %v1173_v24, %v715_v49 }
 0x26b   : > { %v682_v53 = vmax.f32 %v650_v51, 0.0  ;;  %752 = vadd.xlane.f32.xlu2 %v732_v52  ;;  %v1002_v52 = vld [vmem:[%s1253_s2 + $0x4] ss:$0 sm:$0xff] }
 0x26d   : > { %v700_v54 = vpack.c.bf16 %v682_v53, %v682_v53 }
 0x26f   : > { %v716_v55 = vunpack.c.l.bf16 %v700_v54 }
 0x270   : > { %v652_v56 = vpop.f32.mrf.mxu3 }
 0x271   : > { %v653_v57 = vadd.f32 %v1167_v19, %v652_v56  ;;  %v733_v58 = vmul.f32 %v1173_v24, %v716_v55 }
 0x273   : > { %v683_v59 = vmax.f32 %v653_v57, 0.0  ;;  %754 = vadd.xlane.f32.xlu2 %v733_v58 }
 0x275   : > { %v701_v60 = vpack.c.bf16 %v683_v59, %v683_v59 }
 0x277   : > { %v717_v61 = vunpack.c.l.bf16 %v701_v60 }
 0x278   : > { %v654_v62 = vpop.f32.mrf.mxu3 }
 0x279   : > { %v655_v63 = vadd.f32 %v1167_v19, %v654_v62  ;;  %v734_v0 = vmul.f32 %v1173_v24, %v717_v61 }
 0x27b   : > { %v684_v1 = vmax.f32 %v655_v63, 0.0  ;;  %756 = vadd.xlane.f32.xlu0 %v734_v0 }
 0x27d   : > { %v702_v2 = vpack.c.bf16 %v684_v1, %v684_v1 }
 0x27f   : > { %v718_v3 = vunpack.c.l.bf16 %v702_v2 }
 0x280   : > { %v657_v4 = vpop.f32.mrf.mxu3 }
 0x281   : > { %v658_v5 = vadd.f32 %v1167_v19, %v657_v4  ;;  %v735_v6 = vmul.f32 %v1173_v24, %v718_v3 }
 0x283   : > { %v685_v7 = vmax.f32 %v658_v5, 0.0  ;;  %758 = vadd.xlane.f32.xlu1 %v735_v6 }
 0x285   : > { %v703_v8 = vpack.c.bf16 %v685_v7, %v685_v7 }
 0x287   : > { %v719_v9 = vunpack.c.l.bf16 %v703_v8 }
 0x288   : > { %v659_v10 = vpop.f32.mrf.mxu3 }
 0x289   : > { %v660_v11 = vadd.f32 %v1167_v19, %v659_v10  ;;  %v736_v12 = vmul.f32 %v1173_v24, %v719_v9 }
 0x28b   : > { %v686_v13 = vmax.f32 %v660_v11, 0.0  ;;  %760 = vadd.xlane.f32.xlu2 %v736_v12 }
 0x28d   : > { %v704_v14 = vpack.c.bf16 %v686_v13, %v686_v13 }
 0x28f   : > { %v720_v15 = vunpack.c.l.bf16 %v704_v14 }
 0x290   : > { %v662_v16 = vpop.f32.mrf.mxu3 }
 0x291   : > { %v663_v17 = vadd.f32 %v1167_v19, %v662_v16  ;;  %v737_v18 = vmul.f32 %v1173_v24, %v720_v15 }
 0x293   : > { %v687_v20 = vmax.f32 %v663_v17, 0.0  ;;  %762 = vadd.xlane.f32.xlu0 %v737_v18 }
 0x295   : > { %v705_v21 = vpack.c.bf16 %v687_v20, %v687_v20 }
 0x297   : > { %v721_v22 = vunpack.c.l.bf16 %v705_v21 }
 0x298   : > { %v664_v23 = vpop.f32.mrf.mxu3 }
 0x299   : > { %v665_v25 = vadd.f32 %v1167_v19, %v664_v23  ;;  %v738_v26 = vmul.f32 %v1173_v24, %v721_v22 }
 0x29b   : > { %v688_v27 = vmax.f32 %v665_v25, 0.0  ;;  %764 = vadd.xlane.f32.xlu1 %v738_v26 }
 0x29d   : > { %v706_v28 = vpack.c.bf16 %v688_v27, %v688_v27 }
 0x29f   : > { %v722_v29 = vunpack.c.l.bf16 %v706_v28 }
 0x2a0   : > { %v667_v30 = vpop.f32.mrf.mxu3 }
 0x2a1   : > { %v668_v31 = vadd.f32 %v1167_v19, %v667_v30  ;;  %v739_v32 = vmul.f32 %v1173_v24, %v722_v29 }
 0x2a3   : > { %v689_v33 = vmax.f32 %v668_v31, 0.0  ;;  %766 = vadd.xlane.f32.xlu2 %v739_v32 }
 0x2a5   : > { %v707_v34 = vpack.c.bf16 %v689_v33, %v689_v33 }
 0x2a7   : > { %v723_v36 = vunpack.c.l.bf16 %v707_v34 }
 0x2a8   : > { %v669_v37 = vpop.f32.mrf.mxu3 }
 0x2a9   : > { %v670_v38 = vadd.f32 %v1167_v19, %v669_v37  ;;  %v740_v39 = vmul.f32 %v1173_v24, %v723_v36 }
 0x2ab   : > { %v690_v40 = vmax.f32 %v670_v38, 0.0  ;;  %768 = vadd.xlane.f32.xlu0 %v740_v39 }
 0x2ad   : > { %v708_v35 = vpack.c.bf16 %v690_v40, %v690_v40 }
 0x2af   : > { %v724_v41 = vunpack.c.l.bf16 %v708_v35 }
 0x2b0   : > { %v672_v42 = vpop.f32.mrf.mxu3 }
 0x2b1   : > { %v673_v43 = vadd.f32 %v1167_v19, %v672_v42  ;;  %v741_v44 = vmul.f32 %v1173_v24, %v724_v41 }
 0x2b3   : > { %v691_v45 = vmax.f32 %v673_v43, 0.0  ;;  %770 = vadd.xlane.f32.xlu1 %v741_v44 }
 0x2b5   : > { %v709_v46 = vpack.c.bf16 %v691_v45, %v691_v45 }
 0x2b7   : > { %v725_v47 = vunpack.c.l.bf16 %v709_v46 }
 0x2b8   : > { %v674_v48 = vpop.f32.mrf.mxu3 }
 0x2b9   : > { %v675_v49 = vadd.f32 %v1167_v19, %v674_v48  ;;  %v742_v50 = vmul.f32 %v1173_v24, %v725_v47 }
 0x2bb   : > { %v692_v51 = vmax.f32 %v675_v49, 0.0  ;;  %772 = vadd.xlane.f32.xlu2 %v742_v50 }
 0x2bd   : > { %v710_v53 = vpack.c.bf16 %v692_v51, %v692_v51 }
 0x2be   : > { %v745_v19 = vpop.xlane.xlu0 %744 }
 0x2bf   : > { %v726_v54 = vunpack.c.l.bf16 %v710_v53  ;;  %v777_v55 = vadd.f32 %v1002_v52, %v745_v19 }
 0x2c1   : > { %794 = vst.msk [vmem:[%s1213_s15] sm:$0xff] %vm793_vm2, %v777_v55  ;;  %v743_v56 = vmul.f32 %v1173_v24, %v726_v54 }
 0x2c3   : > { %774 = vadd.xlane.f32.xlu0 %v743_v56 }
 0x2c6   : > { %v747_v57 = vpop.xlane.xlu0 %746 }
 0x2c7   : > { %v778_v58 = vadd.f32 %v1002_v52, %v747_v57 }
 0x2c9   : > { %795 = vst.msk [vmem:[%s1213_s15 + $0x8] sm:$0xff] %vm793_vm2, %v778_v58 }
 0x2ce   : > { %v749_v59 = vpop.xlane.xlu1 %748 }
 0x2cf   : > { %v779_v60 = vadd.f32 %v1002_v52, %v749_v59 }
 0x2d1   : > { %796 = vst.msk [vmem:[%s1213_s15 + $0x10] sm:$0xff] %vm793_vm2, %v779_v60 }
 0x2d6   : > { %v751_v61 = vpop.xlane.xlu1 %750 }
 0x2d7   : > { %v780_v62 = vadd.f32 %v1002_v52, %v751_v61 }
 0x2d9   : > { %797 = vst.msk [vmem:[%s1213_s15 + $0x18] sm:$0xff] %vm793_vm2, %v780_v62 }
 0x2de   : > { %v753_v63 = vpop.xlane.xlu2 %752 }
 0x2df   : > { %v781_v0 = vadd.f32 %v1002_v52, %v753_v63 }
 0x2e1   : > { %798 = vst.msk [vmem:[%s1213_s15 + $0x20] sm:$0xff] %vm793_vm2, %v781_v0 }
 0x2e6   : > { %v755_v24 = vpop.xlane.xlu2 %754 }
 0x2e7   : > { %v782_v1 = vadd.f32 %v1002_v52, %v755_v24 }
 0x2e9   : > { %799 = vst.msk [vmem:[%s1213_s15 + $0x28] sm:$0xff] %vm793_vm2, %v782_v1 }
 0x2ee   : > { %v757_v2 = vpop.xlane.xlu0 %756 }
 0x2ef   : > { %v783_v3 = vadd.f32 %v1002_v52, %v757_v2 }
 0x2f1   : > { %800 = vst.msk [vmem:[%s1213_s15 + $0x30] sm:$0xff] %vm793_vm2, %v783_v3 }
 0x2f6   : > { %v759_v4 = vpop.xlane.xlu1 %758 }
 0x2f7   : > { %v784_v5 = vadd.f32 %v1002_v52, %v759_v4 }
 0x2f9   : > { %801 = vst.msk [vmem:[%s1213_s15 + $0x38] sm:$0xff] %vm793_vm2, %v784_v5 }
 0x2fe   : > { %v761_v6 = vpop.xlane.xlu2 %760 }
 0x2ff   : > { %v785_v7 = vadd.f32 %v1002_v52, %v761_v6 }
 0x301   : > { %802 = vst.msk [vmem:[%s1213_s15 + $0x40] sm:$0xff] %vm793_vm2, %v785_v7 }
 0x306   : > { %v763_v8 = vpop.xlane.xlu0 %762 }
 0x307   : > { %v786_v9 = vadd.f32 %v1002_v52, %v763_v8 }
 0x309   : > { %803 = vst.msk [vmem:[%s1213_s15 + $0x48] sm:$0xff] %vm793_vm2, %v786_v9 }
 0x30e   : > { %v765_v10 = vpop.xlane.xlu1 %764 }
 0x30f   : > { %v787_v11 = vadd.f32 %v1002_v52, %v765_v10 }
 0x311   : > { %804 = vst.msk [vmem:[%s1213_s15 + $0x50] sm:$0xff] %vm793_vm2, %v787_v11 }
 0x316   : > { %v767_v12 = vpop.xlane.xlu2 %766 }
 0x317   : > { %v788_v13 = vadd.f32 %v1002_v52, %v767_v12 }
 0x319   : > { %805 = vst.msk [vmem:[%s1213_s15 + $0x58] sm:$0xff] %vm793_vm2, %v788_v13 }
 0x31e   : > { %v769_v14 = vpop.xlane.xlu0 %768 }
 0x31f   : > { %v789_v15 = vadd.f32 %v1002_v52, %v769_v14 }
 0x321   : > { %806 = vst.msk [vmem:[%s1213_s15 + $0x60] sm:$0xff] %vm793_vm2, %v789_v15 }
 0x326   : > { %v771_v16 = vpop.xlane.xlu1 %770 }
 0x327   : > { %v790_v17 = vadd.f32 %v1002_v52, %v771_v16 }
 0x329   : > { %807 = vst.msk [vmem:[%s1213_s15 + $0x68] sm:$0xff] %vm793_vm2, %v790_v17 }
 0x32e   : > { %v773_v18 = vpop.xlane.xlu2 %772 }
 0x32f   : > { %v791_v20 = vadd.f32 %v1002_v52, %v773_v18 }
 0x331   : > { %808 = vst.msk [vmem:[%s1213_s15 + $0x70] sm:$0xff] %vm793_vm2, %v791_v20 }
 0x336   : > { %v775_v21 = vpop.xlane.xlu0 %774 }
 0x337   : > { %v792_v22 = vadd.f32 %v1002_v52, %v775_v21 }
 0x339   : > { %809 = vst.msk [vmem:[%s1213_s15 + $0x78] sm:$0xff] %vm793_vm2, %v792_v22 }
 0x33a PF: > { %s13_s12 = sadd.s32 1, %s1009_s12  }
 0x33b   : > { %p10_p4 = scmp.ge.s32.totalorder %s13_s12, 4  }
 0x33d   :  { %12 = sbr.rel (!%p10_p4) target bundleno = 1 (0x1), region = 62 }

</bundles_post_ra>
